<compile_context>
chip_gen: v5e
topology: v5e:2x2
jax: 0.10.0
libtpu: 0.0.40
codegen_flags: <defaults>
</compile_context>

<pallas_src>
import math

import jax
import jax.numpy as jnp
from jax.experimental import pallas as pl
from jax.experimental.pallas import tpu as pltpu

MIN_TIMESCALE = 1.0
MAX_TIMESCALE = 10000.0

_VMEM_LIMIT_BYTES = 32 * 1024 * 1024        # explicit scoped-VMEM limit (> v5e's 16 MiB default)
_TABLE_VMEM_MAX_BYTES = 8 * 1024 * 1024     # fast path if V*C*itemsize <= this
_ROW_STREAM_BUDGET_BYTES = 8 * 1024 * 1024  # budget for out (+ gather) double buffers


# --------------------------------------------------------------------------
# Fast path: embedding table resident in VMEM (small / medium vocabularies).
# --------------------------------------------------------------------------
def _text_embedding_vmem_kernel(ids_ref, pm_ref, invp_ref, emb_ref, out_ref):
    # ids_ref : [n_pad] int32 in SMEM (scalar prefetch) - flattened token ids
    # pm_ref  : [tr, 2] f32   - col 0 = position, col 1 = mask
    # invp_ref: [2, C]  f32   - row 0 = inv_timescales (dup for cos half, 0 pad),
    #                           row 1 = phase (0 sin half, pi/2 cos half)
    # emb_ref : [V, C]        - VMEM-resident table (constant block index ->
    #                           DMA'd from HBM once, reused by every grid step)
    # out_ref : [tr, C] f32
    tr = out_ref.shape[0]
    base = pl.program_id(0) * tr

    # Row gather straight out of the resident table: one dynamic-sublane load
    # and one row store per token.  No DMA descriptors, no semaphores, no HBM
    # random reads (the table was read exactly once).
    def _gather(r, carry):
        tok = ids_ref[base + r]
        out_ref[pl.ds(r, 1), :] = emb_ref[pl.ds(tok, 1), :].astype(out_ref.dtype)
        return carry

    jax.lax.fori_loop(0, tr, _gather, 0, unroll=8)

    # Positional signal: a single EUP sin; the cos half is sin(x + pi/2) via
    # the precomputed phase row; an odd-C pad column has inv=0, phase=0 -> 0.
    pos = pm_ref[:, 0:1]                                           # [tr, 1]
    mask = pm_ref[:, 1:2]                                          # [tr, 1]
    signal = jnp.sin(pos * invp_ref[0:1, :] + invp_ref[1:2, :])    # [tr, C]

    out_ref[...] = ((out_ref[...] + signal) * mask).astype(out_ref.dtype)


# --------------------------------------------------------------------------
# Large-vocab path: table stays in HBM, rows gathered with manual DMAs that
# are double-buffered across grid steps and waited with one aggregate wait.
# --------------------------------------------------------------------------
def _text_embedding_hbm_kernel(ids_ref, pm_ref, invp_ref, emb_hbm, out_ref,
                               gbuf, sems):
    # emb_hbm : [V, C]        - embedding table left in HBM (pl.ANY)
    # gbuf    : [2, tr, C]    - VMEM gather buffer, double-buffered across steps
    # sems    : DMA sems (2,) - ONE aggregate semaphore per slot
    tr = out_ref.shape[0]
    i = pl.program_id(0)
    nsteps = pl.num_programs(0)
    slot = i % 2

    def _issue(step, slot_):
        base = step * tr
        # TODO(synk): padded tail rows on the last step still issue real DMAs
        # of (clamped) row 0; the aggregate wait needs a static byte count, so
        # they are kept (correct: mask=0 and the [:N] slice drop them).
        def _row(r, carry):
            tok = ids_ref[base + r]
            pltpu.make_async_copy(
                emb_hbm.at[pl.ds(tok, 1), :],
                gbuf.at[slot_, pl.ds(r, 1), :],
                sems.at[slot_],
            ).start()
            return carry
        jax.lax.fori_loop(0, tr, _row, 0, unroll=4)

    # Prime on the first step; prefetch the NEXT step's rows into the other
    # slot before waiting on the current one, so HBM gather latency overlaps
    # this step's compute and output writeback.  (Cross-step dependence ->
    # this grid axis must be "arbitrary"/sequential; set in the wrapper.)
    @pl.when(i == 0)
    def _():
        _issue(i, slot)

    @pl.when(i + 1 < nsteps)
    def _():
        _issue(i + 1, 1 - slot)

    # Positional signal while the gather DMAs are in flight.
    pos = pm_ref[:, 0:1]
    mask = pm_ref[:, 1:2]
    signal = jnp.sin(pos * invp_ref[0:1, :] + invp_ref[1:2, :])

    # Single aggregate wait: all tr row copies of this slot signal one
    # semaphore; a wait descriptor sized to the whole (tr, C) slab decrements
    # exactly the summed per-row transfer bytes (paged-attention idiom).
    pltpu.make_async_copy(gbuf.at[slot], gbuf.at[slot], sems.at[slot]).wait()

    out_ref[...] = ((gbuf[slot].astype(jnp.float32) + signal) * mask).astype(out_ref.dtype)


# --------------------------------------------------------------------------
# Wrapper
# --------------------------------------------------------------------------
def _positional_tables(C):
    """[2, C]: row 0 = inv_timescales (sin half + cos half, 0 pad), row 1 = phase."""
    nts = C // 2
    log_inc = math.log(MAX_TIMESCALE / MIN_TIMESCALE) / max(nts - 1, 1)
    inv = MIN_TIMESCALE * jnp.exp(jnp.arange(nts, dtype=jnp.float32) * -log_inc)
    inv_full = jnp.zeros((C,), jnp.float32).at[:nts].set(inv).at[nts:2 * nts].set(inv)
    phase = jnp.zeros((C,), jnp.float32).at[nts:2 * nts].set(jnp.float32(math.pi / 2))
    return jnp.stack([inv_full, phase], axis=0)


def text_embedding(ids, pos_t, x_mask, emb_table, *, block_rows=256,
                   table_vmem_max_bytes=_TABLE_VMEM_MAX_BYTES):
    """ids: [B,T] int32, pos_t/x_mask: [B,T,1] f32, emb_table: [V,C] -> [B,T,C] f32."""
    B, T = ids.shape
    V, C = emb_table.shape
    N = B * T
    itemsize = jnp.dtype(emb_table.dtype).itemsize
    use_vmem_table = V * C * itemsize <= table_vmem_max_bytes

    # --- flatten to [N] rows; clamp ids defensively ---
    ids_flat = jnp.clip(ids.reshape(N).astype(jnp.int32), 0, V - 1)
    pos_flat = pos_t.reshape(N).astype(jnp.float32)
    mask_flat = x_mask.reshape(N).astype(jnp.float32)

    # --- row-tile sizing ---
    # Per-row VMEM: double-buffered f32 output block (+ double-buffered gather
    # slab in the HBM path) + packed pos/mask.  Budgeted to stay comfortably
    # inside v5e's 16 MiB default scope and v7x's 64 MiB physical VMEM.
    per_row = 2 * C * 4 + 16 + (0 if use_vmem_table else 2 * C * itemsize)
    tr = min(block_rows, max(8, _ROW_STREAM_BUDGET_BYTES // per_row))
    if N > 8:
        tr = min(tr, pl.cdiv(N, 2))   # >= 2 grid steps: both v7x TensorCores get work
    tr = max(8, (tr // 8) * 8)

    n_pad = pl.cdiv(N, tr) * tr
    pad = n_pad - N
    if pad:
        ids_flat = jnp.pad(ids_flat, (0, pad))
        pos_flat = jnp.pad(pos_flat, (0, pad))
        mask_flat = jnp.pad(mask_flat, (0, pad))   # mask=0 -> padded rows are zero
    pm = jnp.stack([pos_flat, mask_flat], axis=-1)          # [n_pad, 2]
    invp = _positional_tables(C)                            # [2, C]

    in_specs = [
        pl.BlockSpec((tr, 2), lambda i, ids: (i, 0)),       # packed pos/mask
        pl.BlockSpec((2, C), lambda i, ids: (0, 0)),        # inv_timescales/phase
    ]
    if use_vmem_table:
        kernel = _text_embedding_vmem_kernel
        # Constant block index -> table is copied into VMEM once and stays
        # resident for every grid step.
        in_specs.append(pl.BlockSpec((V, C), lambda i, ids: (0, 0)))
        scratch = []
        dim_sem = ("parallel",)
    else:
        kernel = _text_embedding_hbm_kernel
        in_specs.append(pl.BlockSpec(memory_space=pl.ANY))  # table stays in HBM
        scratch = [
            pltpu.VMEM((2, tr, C), emb_table.dtype),        # double-buffered gather slab
            pltpu.SemaphoreType.DMA((2,)),                  # one aggregate sem per slot
        ]
        # Cross-step prefetch into the alternate slot requires sequential,
        # in-order grid execution.
        dim_sem = ("arbitrary",)

    out_flat = pl.pallas_call(
        kernel,
        out_shape=jax.ShapeDtypeStruct((n_pad, C), jnp.float32),
        grid_spec=pltpu.PrefetchScalarGridSpec(
            num_scalar_prefetch=1,                          # ids -> SMEM
            grid=(n_pad // tr,),
            in_specs=in_specs,
            out_specs=pl.BlockSpec((tr, C), lambda i, ids: (i, 0)),
            scratch_shapes=scratch,
        ),
        compiler_params=pltpu.CompilerParams(
            dimension_semantics=dim_sem,
            vmem_limit_bytes=_VMEM_LIMIT_BYTES),
    )(ids_flat, pm, invp, emb_table)

    # TODO(synk): for C < 128 the (tr, C) vector stores are lane-masked; at
    # realistic out_channels (>= 128) the output slab is already lane-dense.
    # Packing 128//C rows per output row would need a sublane->lane relayout
    # of the gathered rows, so it is intentionally not done here.
    return out_flat[:N].reshape(B, T, C)


def _reference(ids, pos_t, x_mask, emb_table):
    """Pure-JAX reference mirroring the PyTorch forward."""
    V, C = emb_table.shape
    x = emb_table[ids]                                      # [B, T, C]
    nts = C // 2
    log_inc = math.log(MAX_TIMESCALE / MIN_TIMESCALE) / max(nts - 1, 1)
    inv = MIN_TIMESCALE * jnp.exp(jnp.arange(nts, dtype=pos_t.dtype) * -log_inc)
    scaled = pos_t * inv.reshape(1, 1, -1)                  # [B, T, nts]
    signal = jnp.concatenate([jnp.sin(scaled), jnp.cos(scaled)], -1)
    if C % 2:
        signal = jnp.pad(signal, ((0, 0), (0, 0), (0, C % 2)))
    return (x + signal) * x_mask


if __name__ == "__main__":
    key = jax.random.PRNGKey(0)
    k_ids, k_emb, k_pos = jax.random.split(key, 3)

    B, T, C, V = 2, 8, 32, 40   # small shapes consistent with the module

    ids = jax.random.randint(k_ids, (B, T), 0, V, dtype=jnp.int32)
    emb_table = jax.random.normal(k_emb, (V, C), dtype=jnp.float32) * 0.02
    pos_t = jnp.broadcast_to(
        jnp.arange(T, dtype=jnp.float32)[None, :, None], (B, T, 1)
    ) + jax.random.uniform(k_pos, (B, T, 1), dtype=jnp.float32)
    x_mask = jnp.ones((B, T, 1), dtype=jnp.float32).at[1, T - 2:, 0].set(0.0)

    ref = _reference(ids, pos_t, x_mask, emb_table)

    # 1) VMEM-resident-table fast path (table is tiny here); grid has 2 steps.
    out_fast = jax.block_until_ready(text_embedding(ids, pos_t, x_mask, emb_table))
    assert out_fast.shape == (B, T, C)
    assert jnp.allclose(out_fast, ref, atol=1e-5, rtol=1e-5), "fast path mismatch"

    # 2) Large-vocab HBM-gather path (forced by a zero VMEM-table budget):
    #    exercises cross-step double buffering + single-semaphore aggregate wait.
    out_hbm = jax.block_until_ready(
        text_embedding(ids, pos_t, x_mask, emb_table, table_vmem_max_bytes=0))
    assert jnp.allclose(out_hbm, ref, atol=1e-5, rtol=1e-5), "HBM path mismatch"

    # 3) Padded-tail case (N not a multiple of the row tile), both paths.
    T2 = 11
    ids2 = jax.random.randint(k_ids, (B, T2), 0, V, dtype=jnp.int32)
    pos2 = jnp.broadcast_to(
        jnp.arange(T2, dtype=jnp.float32)[None, :, None], (B, T2, 1))
    mask2 = jnp.ones((B, T2, 1), dtype=jnp.float32).at[0, T2 - 3:, 0].set(0.0)
    ref2 = _reference(ids2, pos2, mask2, emb_table)
    out2_fast = jax.block_until_ready(text_embedding(ids2, pos2, mask2, emb_table))
    assert jnp.allclose(out2_fast, ref2, atol=1e-5, rtol=1e-5), "fast tail mismatch"
    out2_hbm = jax.block_until_ready(
        text_embedding(ids2, pos2, mask2, emb_table, table_vmem_max_bytes=0))
    assert jnp.allclose(out2_hbm, ref2, atol=1e-5, rtol=1e-5), "HBM tail mismatch"

    print("KERNEL_OK")
</pallas_src>

<mosaic_0001>
module attributes {stable_mosaic.version = 11 : i64} {
  func.func @_text_embedding_vmem_kernel(%arg0: i32, %arg1: memref<16xi32, #tpu.memory_space<smem>>, %arg2: memref<8x2xf32, #tpu.memory_space<vmem>>, %arg3: memref<2x32xf32, #tpu.memory_space<vmem>>, %arg4: memref<40x32xf32, #tpu.memory_space<vmem>>, %arg5: memref<8x32xf32, #tpu.memory_space<vmem>>) attributes {dimension_semantics = [#tpu.dimension_semantics<parallel>], iteration_bounds = array<i64: 2>, scalar_prefetch = 1 : i64, scratch_operands = 0 : i64, tpu.core_type = #tpu.core_type<tc>, window_params = [{transform_indices = @transform_0, window_bounds = array<i64: 8, 2>}, {pipeline_mode = #tpu.pipeline_mode<synchronous>, transform_indices = @transform_1, window_bounds = array<i64: 2, 32>}, {pipeline_mode = #tpu.pipeline_mode<synchronous>, transform_indices = @transform_2, window_bounds = array<i64: 40, 32>}, {transform_indices = @transform_3, window_bounds = array<i64: 8, 32>}]} {
    %c8_i32 = arith.constant 8 : i32
    %0 = arith.muli %arg0, %c8_i32 : i32
    %c0_i32 = arith.constant 0 : i32
    %1 = arith.addi %0, %c0_i32 : i32
    %2 = arith.index_cast %1 : i32 to index
    %3 = memref.load %arg1[%2] : memref<16xi32, #tpu.memory_space<smem>>
    %4 = arith.index_cast %3 : i32 to index
    %c0 = arith.constant 0 : index
    %5 = vector.load %arg4[%4, %c0] : memref<40x32xf32, #tpu.memory_space<vmem>>, vector<1x32xf32>
    %6 = arith.index_cast %c0_i32 : i32 to index
    %c0_0 = arith.constant 0 : index
    %7 = vector.load %arg5[%6, %c0_0] : memref<8x32xf32, #tpu.memory_space<vmem>>, vector<1x32xf32>
    tpu.vector_store %arg5[%6, %c0_0], %5 {strides = array<i32>} : memref<8x32xf32, #tpu.memory_space<vmem>>, vector<1x32xf32>,
    %c1_i32 = arith.constant 1 : i32
    %8 = arith.addi %0, %c1_i32 : i32
    %9 = arith.index_cast %8 : i32 to index
    %10 = memref.load %arg1[%9] : memref<16xi32, #tpu.memory_space<smem>>
    %11 = arith.index_cast %10 : i32 to index
    %c0_1 = arith.constant 0 : index
    %12 = vector.load %arg4[%11, %c0_1] : memref<40x32xf32, #tpu.memory_space<vmem>>, vector<1x32xf32>
    %13 = arith.index_cast %c1_i32 : i32 to index
    %c0_2 = arith.constant 0 : index
    %14 = vector.load %arg5[%13, %c0_2] : memref<8x32xf32, #tpu.memory_space<vmem>>, vector<1x32xf32>
    tpu.vector_store %arg5[%13, %c0_2], %12 {strides = array<i32>} : memref<8x32xf32, #tpu.memory_space<vmem>>, vector<1x32xf32>,
    %c2_i32 = arith.constant 2 : i32
    %15 = arith.addi %0, %c2_i32 : i32
    %16 = arith.index_cast %15 : i32 to index
    %17 = memref.load %arg1[%16] : memref<16xi32, #tpu.memory_space<smem>>
    %18 = arith.index_cast %17 : i32 to index
    %c0_3 = arith.constant 0 : index
    %19 = vector.load %arg4[%18, %c0_3] : memref<40x32xf32, #tpu.memory_space<vmem>>, vector<1x32xf32>
    %20 = arith.index_cast %c2_i32 : i32 to index
    %c0_4 = arith.constant 0 : index
    %21 = vector.load %arg5[%20, %c0_4] : memref<8x32xf32, #tpu.memory_space<vmem>>, vector<1x32xf32>
    tpu.vector_store %arg5[%20, %c0_4], %19 {strides = array<i32>} : memref<8x32xf32, #tpu.memory_space<vmem>>, vector<1x32xf32>,
    %c3_i32 = arith.constant 3 : i32
    %22 = arith.addi %0, %c3_i32 : i32
    %23 = arith.index_cast %22 : i32 to index
    %24 = memref.load %arg1[%23] : memref<16xi32, #tpu.memory_space<smem>>
    %25 = arith.index_cast %24 : i32 to index
    %c0_5 = arith.constant 0 : index
    %26 = vector.load %arg4[%25, %c0_5] : memref<40x32xf32, #tpu.memory_space<vmem>>, vector<1x32xf32>
    %27 = arith.index_cast %c3_i32 : i32 to index
    %c0_6 = arith.constant 0 : index
    %28 = vector.load %arg5[%27, %c0_6] : memref<8x32xf32, #tpu.memory_space<vmem>>, vector<1x32xf32>
    tpu.vector_store %arg5[%27, %c0_6], %26 {strides = array<i32>} : memref<8x32xf32, #tpu.memory_space<vmem>>, vector<1x32xf32>,
    %c4_i32 = arith.constant 4 : i32
    %29 = arith.addi %0, %c4_i32 : i32
    %30 = arith.index_cast %29 : i32 to index
    %31 = memref.load %arg1[%30] : memref<16xi32, #tpu.memory_space<smem>>
    %32 = arith.index_cast %31 : i32 to index
    %c0_7 = arith.constant 0 : index
    %33 = vector.load %arg4[%32, %c0_7] : memref<40x32xf32, #tpu.memory_space<vmem>>, vector<1x32xf32>
    %34 = arith.index_cast %c4_i32 : i32 to index
    %c0_8 = arith.constant 0 : index
    %35 = vector.load %arg5[%34, %c0_8] : memref<8x32xf32, #tpu.memory_space<vmem>>, vector<1x32xf32>
    tpu.vector_store %arg5[%34, %c0_8], %33 {strides = array<i32>} : memref<8x32xf32, #tpu.memory_space<vmem>>, vector<1x32xf32>,
    %c5_i32 = arith.constant 5 : i32
    %36 = arith.addi %0, %c5_i32 : i32
    %37 = arith.index_cast %36 : i32 to index
    %38 = memref.load %arg1[%37] : memref<16xi32, #tpu.memory_space<smem>>
    %39 = arith.index_cast %38 : i32 to index
    %c0_9 = arith.constant 0 : index
    %40 = vector.load %arg4[%39, %c0_9] : memref<40x32xf32, #tpu.memory_space<vmem>>, vector<1x32xf32>
    %41 = arith.index_cast %c5_i32 : i32 to index
    %c0_10 = arith.constant 0 : index
    %42 = vector.load %arg5[%41, %c0_10] : memref<8x32xf32, #tpu.memory_space<vmem>>, vector<1x32xf32>
    tpu.vector_store %arg5[%41, %c0_10], %40 {strides = array<i32>} : memref<8x32xf32, #tpu.memory_space<vmem>>, vector<1x32xf32>,
    %c6_i32 = arith.constant 6 : i32
    %43 = arith.addi %0, %c6_i32 : i32
    %44 = arith.index_cast %43 : i32 to index
    %45 = memref.load %arg1[%44] : memref<16xi32, #tpu.memory_space<smem>>
    %46 = arith.index_cast %45 : i32 to index
    %c0_11 = arith.constant 0 : index
    %47 = vector.load %arg4[%46, %c0_11] : memref<40x32xf32, #tpu.memory_space<vmem>>, vector<1x32xf32>
    %48 = arith.index_cast %c6_i32 : i32 to index
    %c0_12 = arith.constant 0 : index
    %49 = vector.load %arg5[%48, %c0_12] : memref<8x32xf32, #tpu.memory_space<vmem>>, vector<1x32xf32>
    tpu.vector_store %arg5[%48, %c0_12], %47 {strides = array<i32>} : memref<8x32xf32, #tpu.memory_space<vmem>>, vector<1x32xf32>,
    %c7_i32 = arith.constant 7 : i32
    %50 = arith.addi %0, %c7_i32 : i32
    %51 = arith.index_cast %50 : i32 to index
    %52 = memref.load %arg1[%51] : memref<16xi32, #tpu.memory_space<smem>>
    %53 = arith.index_cast %52 : i32 to index
    %c0_13 = arith.constant 0 : index
    %54 = vector.load %arg4[%53, %c0_13] : memref<40x32xf32, #tpu.memory_space<vmem>>, vector<1x32xf32>
    %55 = arith.index_cast %c7_i32 : i32 to index
    %c0_14 = arith.constant 0 : index
    %56 = vector.load %arg5[%55, %c0_14] : memref<8x32xf32, #tpu.memory_space<vmem>>, vector<1x32xf32>
    tpu.vector_store %arg5[%55, %c0_14], %54 {strides = array<i32>} : memref<8x32xf32, #tpu.memory_space<vmem>>, vector<1x32xf32>,
    %c8_i32_15 = arith.constant 8 : i32
    %c0_16 = arith.constant 0 : index
    %c0_17 = arith.constant 0 : index
    %57 = vector.load %arg2[%c0_16, %c0_17] : memref<8x2xf32, #tpu.memory_space<vmem>>, vector<8x1xf32>
    %c0_18 = arith.constant 0 : index
    %c1 = arith.constant 1 : index
    %58 = vector.load %arg2[%c0_18, %c1] : memref<8x2xf32, #tpu.memory_space<vmem>>, vector<8x1xf32>
    %c0_19 = arith.constant 0 : index
    %c0_20 = arith.constant 0 : index
    %59 = vector.load %arg3[%c0_19, %c0_20] : memref<2x32xf32, #tpu.memory_space<vmem>>, vector<1x32xf32>
    %60 = vector.broadcast %57 : vector<8x1xf32> to vector<8x32xf32>
    %61 = vector.broadcast %59 : vector<1x32xf32> to vector<8x32xf32>
    %62 = arith.mulf %60, %61 : vector<8x32xf32>
    %c1_21 = arith.constant 1 : index
    %c0_22 = arith.constant 0 : index
    %63 = vector.load %arg3[%c1_21, %c0_22] : memref<2x32xf32, #tpu.memory_space<vmem>>, vector<1x32xf32>
    %64 = vector.broadcast %63 : vector<1x32xf32> to vector<8x32xf32>
    %65 = arith.addf %62, %64 : vector<8x32xf32>
    %66 = math.sin %65 : vector<8x32xf32>
    %c0_23 = arith.constant 0 : index
    %c0_24 = arith.constant 0 : index
    %67 = vector.load %arg5[%c0_23, %c0_24] : memref<8x32xf32, #tpu.memory_space<vmem>>, vector<8x32xf32>
    %68 = arith.addf %67, %66 : vector<8x32xf32>
    %69 = vector.broadcast %58 : vector<8x1xf32> to vector<8x32xf32>
    %70 = arith.mulf %68, %69 : vector<8x32xf32>
    %c0_25 = arith.constant 0 : index
    %c0_26 = arith.constant 0 : index
    %71 = vector.load %arg5[%c0_25, %c0_26] : memref<8x32xf32, #tpu.memory_space<vmem>>, vector<8x32xf32>
    tpu.vector_store %arg5[%c0_25, %c0_26], %70 {strides = array<i32>} : memref<8x32xf32, #tpu.memory_space<vmem>>, vector<8x32xf32>,
    return
  }
  func.func @transform_0(%arg0: i32, %arg1: memref<16xi32, #tpu.memory_space<smem>>) -> (i32, i32) {
    %c0_i32 = arith.constant 0 : i32
    %c0_i32_0 = arith.constant 0 : i32
    return %arg0, %c0_i32 : i32, i32
  }
  func.func @transform_1(%arg0: i32, %arg1: memref<16xi32, #tpu.memory_space<smem>>) -> (i32, i32) {
    %c0_i32 = arith.constant 0 : i32
    %c0_i32_0 = arith.constant 0 : i32
    %c0_i32_1 = arith.constant 0 : i32
    return %c0_i32, %c0_i32_0 : i32, i32
  }
  func.func @transform_2(%arg0: i32, %arg1: memref<16xi32, #tpu.memory_space<smem>>) -> (i32, i32) {
    %c0_i32 = arith.constant 0 : i32
    %c0_i32_0 = arith.constant 0 : i32
    %c0_i32_1 = arith.constant 0 : i32
    return %c0_i32, %c0_i32_0 : i32, i32
  }
  func.func @transform_3(%arg0: i32, %arg1: memref<16xi32, #tpu.memory_space<smem>>) -> (i32, i32) {
    %c0_i32 = arith.constant 0 : i32
    %c0_i32_0 = arith.constant 0 : i32
    return %arg0, %c0_i32 : i32, i32
  }
}

</mosaic_0001>

<bundles_post_ra>
// kernel: tpu_custom_call.1
= control target key start
LH: loop header
LB: loop body
LE: loop exit
PB: predicated region body
PF: predicated region fallthrough
CT: control target
= control target key end

     0   :  { %s619_s18 = smov [#allocation3]   ;;  %s860_s0 = inlined_call_operand.vmem [shape: s32[16], index: 0, kind: input, shape index: {}]   ;;  %s861_s1 = inlined_call_operand.vmem [shape: f32[16,2], index: 1, kind: input, shape index: {}]   ;;  %s862_s2 = inlined_call_operand.vmem [shape: f32[2,32], index: 2, kind: input, shape index: {}]   ;;  %s863_s3 = inlined_call_operand.vmem [shape: f32[40,32], index: 3, kind: input, shape index: {}]   ;;  %s864_s4 = inlined_call_operand.hbm [shape: f32[16,32], index: 4, kind: output, shape index: {}]  }
   0x1   :  { %870 = sst [smem:[#allocation12_spill]] %s861_s1  ;;  %s10_s17 = sshll.u32 %s860_s0, 4  ;;  %s11_s17 = int_to_ptr.vmem [resolvable:$true] %s10_s17 }
   0x2   :  { %13 = dma.vmem_to_smem %s11_s17, 16, %s619_s18, [#allocation2] }
   0x3   :  { %597 = dma.done.wait [#allocation2], 16 }
   0x4   :  { %598 = vsyncadd [#allocation2], 4294967280 }
   0x5   :  { %16 = sfence }
   0x6   :  { %17 = vsyncpa [#allocation5], 0 }
   0x7   :  { %19 = vsyncpa [#allocation5 + $0x1], 0  ;;  %s656_s19 = smov 0   ;;  %s658_s20 = smov 0  }
   0x8   :  { %s660_s21 = smov 0   ;;  %s662_s22 = smov 0  }
   0x9 LB: > { %871 = sst [smem:[#allocation8_spill]] %s613_s21  ;;  %s474_s0 = sadd.s32 4294967295, %s617_s22   ;;  %s617_s22 = sphi %s662_s22, %s880_s22   ;;  %s613_s21 = sphi %s660_s21, %s882_s21   ;;  %s609_s20 = sphi %s658_s20, %s884_s20   ;;  %s605_s19 = sphi %s656_s19, %s883_s19  }
   0xa   : > { %s475_s23 = sadd.s32 4294967294, %s617_s22   ;;  %s679_s24 = sadd.s32 1, %s617_s22  }
   0xb   : > { %872 = sst [smem:[#allocation9_spill]] %s679_s24  ;;  %s100_s25 = sadd.s32 1, %s613_s21 }
   0xc   : > { %s97_s26 = ssub.s32 %s617_s22, %s679_s24  ;;  %p110_p0 = scmp.ne.s32.totalorder %s613_s21, %s609_s20 }
   0xd   : > { %p98_p1 = scmp.eq.s32.totalorder %s97_s26, 0  ;;  %p111_p2 = scmp.eq.s32.totalorder %s474_s0, 1 }
   0xe   : > { %p116_p3 = scmp.ne.s32.totalorder %s609_s20, %s605_s19  ;;  %p117_p4 = scmp.eq.s32.totalorder %s475_s23, 1 }
   0xf   : > { %s689_s27 = scalar_select %p98_p1, %s613_s21, %s100_s25  }
  0x10   : > { %p691_p5 = por %p111_p2, %p110_p0  ;;  %p695_p6 = por %p117_p4, %p116_p3 }
  0x11   : > { %873 = sst [smem:[#allocation10_spill]] %s689_s27  ;;  %p478_p7 = scmp.ge.s32.totalorder %s617_s22, 1 }
  0x12   : > { %s875_s29 = scalar_select %p695_p6, 1, 0 }
  0x13   : > { %p148_p8 = scmp.lt.s32.totalorder %s617_s22, 3 }
  0x14   : > { %876 = sst [smem:[#allocation11_spill]] %s875_s29 }
  0x15   : > { %p149_p9 = pnand %p478_p7, %p148_p8 }
  0x16   : > { %p171_p10 = scmp.lt.s32.totalorder (!%p149_p9), %s474_s0, 1  ;;  %s877_s1 = sld [smem:[#allocation12_spill]] (!%p149_p9) }
  0x17   : > { %152 = sbr.rel (%p149_p9) target bundleno = 255 (0xff), region = 32  ;;  %s705_s9 = sshll.u32 (!%p149_p9), %s474_s0, 3 }
  0x18   : > { %s181_s10 = sadd.s32 (!%p149_p9), 1, %s705_s9  ;;  %s186_s11 = sadd.s32 (!%p149_p9), 2, %s705_s9 }
  0x19   : > { %s176_s12 = sld [smem:[#allocation3 + %s705_s9]] (!%p149_p9)  ;;  %s191_s13 = sadd.s32 (!%p149_p9), 3, %s705_s9 }
  0x1a   : > { %s182_s14 = sld [smem:[#allocation3 + %s181_s10]] (!%p149_p9)  ;;  %s196_s15 = sadd.s32 (!%p149_p9), 4, %s705_s9 }
  0x1b   : > { %s187_s16 = sld [smem:[#allocation3 + %s186_s11]] (!%p149_p9)  ;;  %s201_s17 = sadd.s32 (!%p149_p9), 5, %s705_s9 }
  0x1c   : > { %v620_v0 = vmov 0   ;;  %s172_s30 = scalar_select %p171_p10, %s474_s0, 1  ;;  %v621_v2 = vmov 1   ;;  %vm179_vm0 = vcmask 253952   ;;  %v539_v9 = vld [vmem:[%s862_s2] ss:$0 sm:$0xff] }
  0x1d   : > { %537 = vset.pattern.permute.xlu0 %v620_v0  ;;  %s192_s18 = sld [smem:[#allocation3 + %s191_s13]]  ;;  %s206_s0 = sadd.s32 6, %s705_s9  ;;  %v540_v12 = vld [vmem:[%s862_s2 + $0x1] ss:$0 sm:$0xff]  ;;  %v622_v27 = vmov 2102212464  }
  0x1e   : > { %s480_s5 = sshll.u32 %s172_s30, 3  ;;  %s197_s23 = sld [smem:[#allocation3 + %s196_s15]]  ;;  %v623_v29 = vmov 920167782   ;;  %v624_v32 = vmov 1326507024  }
  0x1f   : > { %s174_s8 = scalar_lea.vmem %s877_s1, %s480_s5  ;;  %s211_s25 = sadd.s32 7, %s705_s9  ;;  %v625_v34 = vmov 683565275   ;;  %v626_v36 = vmov 2475754826  }
  0x20   : > { %v216_v1 = vld [vmem:[%s174_s8] sm:$0xff]  ;;  %s202_s26 = sld [smem:[#allocation3 + %s201_s17]]  ;;  %s869_s30 = sand.u32 1, %s609_s20   ;;  %v627_v39 = vmov 2131351028  }
  0x21   : > { %220 = vperm.xlu0 %537, %v216_v1   ;;  %s207_s5 = sld [smem:[#allocation3 + %s206_s0]]  ;;  %s177_s1 = scalar_lea.vmem %s863_s3, %s176_s12 }
  0x22   : > { %s212_s6 = sld [smem:[#allocation3 + %s211_s25]]  ;;  %s479_s27 = sshll.u32 %s869_s30, 3  ;;  %v178_v3 = vld [vmem:[%s177_s1] sm:$0x1] }
  0x23   : > { %s183_s10 = scalar_lea.vmem %s863_s3, %s182_s14  ;;  %s188_s13 = scalar_lea.vmem %s863_s3, %s187_s16 }
  0x24   : > { %s193_s0 = scalar_lea.vmem %s863_s3, %s192_s18  ;;  %v184_v4 = vld [vmem:[%s183_s10] sm:$0x1]  ;;  %s198_s12 = scalar_lea.vmem %s863_s3, %s197_s23 }
  0x25   : > { %v189_v5 = vld [vmem:[%s188_s13] sm:$0x1]  ;;  %s739_s14 = scalar_lea.vmem [#allocation4], %s479_s27  ;;  %s403_s11 = scalar_lea.hbm %s864_s4, %s705_s9 }
  0x26   : > { %s203_s21 = scalar_lea.vmem %s863_s3, %s202_s26  ;;  %v194_v6 = vld [vmem:[%s193_s0] sm:$0x1]  ;;  %180 = vst.msk [vmem:[%s739_s14] sm:$0x1] %vm179_vm0, %v178_v3  ;;  %s405_s13 = sshll.u32 %s739_s14, 4  ;;  %s406_s13 = int_to_ptr.vmem [resolvable:$true] %s405_s13 }
  0x27   : > { %s208_s1 = scalar_lea.vmem %s863_s3, %s207_s5  ;;  %v199_v7 = vld [vmem:[%s198_s12] sm:$0x1]  ;;  %185 = vst.msk [vmem:[%s739_s14 + $0x1] sm:$0x1] %vm179_vm0, %v184_v4  ;;  %s407_s15 = sshll.u32 %s403_s11, 4  ;;  %s408_s15 = int_to_ptr.hbm [resolvable:$true] %s407_s15 }
  0x28   : > { %s213_s23 = scalar_lea.vmem %s863_s3, %s212_s6  ;;  %v204_v8 = vld [vmem:[%s203_s21] sm:$0x1]  ;;  %190 = vst.msk [vmem:[%s739_s14 + $0x2] sm:$0x1] %vm179_vm0, %v189_v5  ;;  %s878_s9 = sand.u32 1, %s609_s20  }
  0x29   : > { %538 = vset.pattern.permute.xlu0 %v621_v2  ;;  %v209_v10 = vld [vmem:[%s208_s1] sm:$0x1]  ;;  %195 = vst.msk [vmem:[%s739_s14 + $0x3] sm:$0x1] %vm179_vm0, %v194_v6  ;;  %s393_s17 = scalar_lea.sflag [#allocation5], %s878_s9  ;;  %s567_s0 = sshra.s32 %s408_s15, 4  ;;  %s568_s0 = int_to_ptr.hbm [resolvable:$true] %s567_s0 }
  0x2a   : > { %386 = vperm.xlu0 %538, %v216_v1   ;;  %v214_v11 = vld [vmem:[%s213_s23] sm:$0x1]  ;;  %200 = vst.msk [vmem:[%s739_s14 + $0x4] sm:$0x1] %vm179_vm0, %v199_v7  ;;  %s569_s25 = scalar_lea.hbm %s568_s0, 8  ;;  %s573_s8 = scalar_lea.hbm %s864_s4, 16 }
  0x2b   : > { %205 = vst.msk [vmem:[%s739_s14 + $0x5] sm:$0x1] %vm179_vm0, %v204_v8  ;;  %p570_p11 = scmp.ne.s32.totalorder %s568_s0, %s569_s25  ;;  %p574_p0 = scmp.lt.s32.totalorder %s568_s0, %s864_s4 }
  0x2c   : > { %210 = vst.msk [vmem:[%s739_s14 + $0x6] sm:$0x1] %vm179_vm0, %v209_v10  ;;  %p575_p1 = scmp.lt.s32.totalorder %s573_s8, %s569_s25 }
  0x2d   : > { %215 = vst.msk [vmem:[%s739_s14 + $0x7] sm:$0x1] %vm179_vm0, %v214_v11  ;;  %p571_p12 = pnand %p570_p11, %p691_p5 }
  0x2e   : > { %p576_p2 = por %p575_p1, %p574_p0 }
  0x2f   : > { %p572_p13 = pneg %p571_p12 }
  0x31   : > { %p577_p3 = pnand %p576_p2, %p572_p13 }
  0x93   : > { %v221_v13 = vpop.permute.xlu0 %220 }
  0x94   : > { %v224_v14 = vmul.f32 %v539_v9, %v221_v13 }
  0x96   : > { %v766_v15 = vadd.f32 %v540_v12, %v224_v14 }
  0x98   : > { %v231_v16 = vand.u32 2139095040, %v766_v15  ;;  %v228_v19 = vand.u32 2147483647, %v766_v15  ;;  %vm230_vm13 = vcmp.lt.s32.totalorder %v766_v15, 0 }
  0x9a   : > { %v232_v17 = vshrl.u32 %v231_v16, 23  ;;  %v235_v21 = vand.u32 8388607, %v228_v19  ;;  %vm229_vm14 = vcmp.le.f32.partialorder %v228_v19, 0.7853982 }
  0x9c   : > { %v482_v18 = vadd.s32 4294967169, %v232_v17  ;;  %v236_v25 = vor.u32 8388608, %v235_v21 }
  0x9e   : > { %v238_v20 = vadd.s32 1, %v482_v18  ;;  %v781_v46 = vshll.u32 %v236_v25, 8 }
  0xa0   : > { %vm239_vm1 = vcmp.gt.s32.totalorder %v238_v20, 0  ;;  %v277_v56 = vand.u32 65535, %v781_v46  ;;  %v278_v58 = vshrl.u32 %v781_v46, 16 }
  0xa1   : > { %v240_v22 = vsel %vm239_vm1, %v238_v20, 0 }
  0xa2   : > { %v242_v23 = vand.u32 31, %v240_v22  ;;  %v774_v26 = vshrl.u32 %v240_v22, 5 }
  0xa4   : > { %v772_v24 = vsub.s32 32, %v242_v23  ;;  %v254_v28 = vshll.u32 %v622_v27, %v242_v23  ;;  %v257_v30 = vshll.u32 %v623_v29, %v242_v23  ;;  %v245_v35 = vshll.u32 %v625_v34, %v242_v23 }
  0xa5   : > { %v248_v38 = vshll.u32 %v626_v36, %v242_v23  ;;  %v251_v41 = vshll.u32 %v627_v39, %v242_v23  ;;  %vm263_vm2 = vcmp.lt.s32.totalorder %v774_v26, 4  ;;  %vm260_vm3 = vcmp.lt.s32.totalorder %v774_v26, 1 }
  0xa6   : > { %v255_v31 = vshrl.u32 %v623_v29, %v772_v24  ;;  %v258_v33 = vshrl.u32 %v624_v32, %v772_v24  ;;  %v246_v37 = vshrl.u32 %v626_v36, %v772_v24  ;;  %v249_v40 = vshrl.u32 %v627_v39, %v772_v24 }
  0xa7   : > { %v252_v42 = vshrl.u32 %v622_v27, %v772_v24  ;;  %vm262_vm4 = vcmp.lt.s32.totalorder %v774_v26, 3  ;;  %vm261_vm5 = vcmp.lt.s32.totalorder %v774_v26, 2  ;;  %v244_v20 = vshrl.u32 %v625_v34, %v772_v24 }
  0xa8   : > { %v256_v43 = vor.u32 %v255_v31, %v254_v28  ;;  %v259_v44 = vor.u32 %v258_v33, %v257_v30  ;;  %v247_v45 = vor.u32 %v246_v37, %v245_v35  ;;  %v250_v47 = vor.u32 %v249_v40, %v248_v38 }
  0xa9   : > { %v253_v48 = vor.u32 %v252_v42, %v251_v41 }
  0xaa   : > { %v269_v49 = vsel %vm263_vm2, %v256_v43, 920167782  ;;  %v273_v50 = vsel %vm263_vm2, %v259_v44, 1326507024  ;;  %v268_v51 = vsel %vm260_vm3, %v247_v45, %v250_v47  ;;  %v264_v28 = vsel %vm260_vm3, %v244_v20, %v247_v45 }
  0xab   : > { %v270_v52 = vsel %vm262_vm4, %v253_v48, %v269_v49  ;;  %v272_v53 = vsel %vm260_vm3, %v250_v47, %v253_v48  ;;  %v274_v55 = vsel %vm262_vm4, %v256_v43, %v273_v50  ;;  %v265_v16 = vsel %vm263_vm2, %v253_v48, 2102212464 }
  0xac   : > { %v271_v54 = vsel %vm261_vm5, %v268_v51, %v270_v52  ;;  %v275_v57 = vsel %vm261_vm5, %v272_v53, %v274_v55  ;;  %v266_v29 = vsel %vm262_vm4, %v250_v47, %v265_v16  ;;  %vm371_vm2 = vweird.f32 %v766_v15 }
  0xad   : > { %v301_v59 = vand.u32 65535, %v271_v54  ;;  %v302_v60 = vshrl.u32 %v271_v54, 16  ;;  %v279_v61 = vand.u32 65535, %v275_v57  ;;  %v280_v62 = vshrl.u32 %v275_v57, 16 }
  0xae   : > { %v267_v34 = vsel %vm261_vm5, %v264_v28, %v266_v29  ;;  %v383_v28 = vld [vmem:[%s739_s14] sm:$0xff]  ;;  %vm390_vm3 = vcmask 261120  }
  0xaf   : > { %v304_v63 = vmul.u32 %v302_v60, %v277_v56  ;;  %v305_v1 = vmul.u32 %v301_v59, %v278_v58  ;;  %v282_v2 = vmul.u32 %v280_v62, %v277_v56  ;;  %v283_v3 = vmul.u32 %v279_v61, %v278_v58 }
  0xb0   : > { %v303_v4 = vmul.u32 %v301_v59, %v277_v56  ;;  %v281_v6 = vmul.u32 %v279_v61, %v277_v56  ;;  %v306_v8 = vmul.u32 %v302_v60, %v278_v58  ;;  %v284_v9 = vmul.u32 %v280_v62, %v278_v58 }
  0xb1   : > { %v307_v5 = vshll.u32 %v304_v63, 16  ;;  %v285_v7 = vshll.u32 %v282_v2, 16  ;;  %v309_v10 = vshll.u32 %v305_v1, 16  ;;  %v287_v12 = vshll.u32 %v283_v3, 16 }
  0xb2   : > { %v308_v25 = vshrl.u32 %v304_v63, 16  ;;  %v286_v30 = vshrl.u32 %v282_v2, 16  ;;  %v310_v32 = vshrl.u32 %v305_v1, 16  ;;  %v288_v35 = vshrl.u32 %v283_v3, 16 }
  0xb3   : > { %vm311_vm6 = vc.u32 %v303_v4, %v307_v5  ;;  %v313_v11 = vadd.s32 %v307_v5, %v303_v4  ;;  %vm289_vm7 = vc.u32 %v281_v6, %v285_v7  ;;  %v291_v13 = vadd.s32 %v285_v7, %v281_v6 }
  0xb4   : > { %v312_v14 = vsel %vm311_vm6, 1, %v620_v0  ;;  %v290_v17 = vsel %vm289_vm7, 1, %v620_v0  ;;  %v321_v39 = vmul.u32 %v781_v46, %v267_v34 }
  0xb5   : > { %v314_v18 = vadd.s32 %v312_v14, %v306_v8  ;;  %vm315_vm8 = vc.u32 %v313_v11, %v309_v10  ;;  %v292_v21 = vadd.s32 %v290_v17, %v284_v9  ;;  %vm293_vm9 = vc.u32 %v291_v13, %v287_v12 }
  0xb6   : > { %v316_v22 = vsel %vm315_vm8, 1, %v620_v0  ;;  %v294_v23 = vsel %vm293_vm9, 1, %v620_v0  ;;  %v317_v0 = vadd.s32 %v313_v11, %v309_v10 }
  0xb7   : > { %v318_v27 = vadd.s32 %v316_v22, %v314_v18  ;;  %v296_v31 = vadd.s32 %v294_v23, %v292_v21 }
  0xb9   : > { %v319_v33 = vadd.s32 %v318_v27, %v308_v25  ;;  %v297_v24 = vadd.s32 %v296_v31, %v286_v30  ;;  %v387_v31 = vpop.permute.xlu0 %386 }
  0xbb   : > { %v320_v36 = vadd.s32 %v319_v33, %v310_v32  ;;  %v298_v37 = vadd.s32 %v297_v24, %v288_v35 }
  0xbd   : > { %v324_v38 = vadd.s32 1, %v320_v36  ;;  %vm323_vm10 = vc.u32 %v298_v37, %v317_v0  ;;  %v322_v51 = vadd.s32 %v317_v0, %v298_v37 }
  0xbf   : > { %v325_v40 = vsel %vm323_vm10, %v324_v38, %v320_v36 }
  0xc0   : > { %v326_v41 = vadd.s32 %v325_v40, %v321_v39 }
  0xc2   : > { %v327_v42 = vadd.s32 536870912, %v326_v41 }
  0xc4   : > { %v328_v43 = vshrl.u32 %v327_v42, 30 }
  0xc6   : > { %v329_v44 = vshll.u32 %v328_v43, 30  ;;  %v352_v1 = vsub.s32 4, %v328_v43 }
  0xc8   : > { %v330_v45 = vsub.s32 %v326_v41, %v329_v44  ;;  %v353_v6 = vsel %vm230_vm13, %v352_v1, %v328_v43 }
  0xc9   : > { %v355_v9 = vsel %vm229_vm14, 0, %v353_v6 }
  0xca   : > { %vm331_vm11 = vcmp.lt.s32.totalorder %v330_v45, 0  ;;  %v332_v47 = vsub.s32 0, %v330_v45  ;;  %v372_v14 = vadd.s32 3, %v355_v9 }
  0xcc   : > { %v333_v48 = vsel %vm331_vm11, %v332_v47, %v330_v45  ;;  %v373_v20 = vand.u32 3, %v372_v14 }
  0xcd   : > { %v334_v49 = vclz %v333_v48 }
  0xce   : > { %vm375_vm15 = vcmp.eq.s32.totalorder %v373_v20, 0  ;;  %vm378_vm0 = vcmp.eq.s32.totalorder %v373_v20, 2  ;;  %vm374_vm1 = vcmp.lt.s32.totalorder %v373_v20, 2 }
  0xcf   : > { %v483_v50 = vadd.s32 4294967294, %v334_v49 }
  0xd1   : > { %vm484_vm12 = vcmp.lt.s32.totalorder %v483_v50, 0 }
  0xd2   : > { %v337_v26 = vsel %vm484_vm12, 0, %v483_v50 }
  0xd3   : > { %v338_v52 = vsub.s32 32, %v337_v26  ;;  %v342_v53 = vsub.s32 4294967266, %v337_v26  ;;  %v339_v54 = vshll.u32 %v330_v45, %v337_v26 }
  0xd5   : > { %v340_v55 = vshrl.u32 %v322_v51, %v338_v52  ;;  %v343_v46 = vadd.s32 127, %v342_v53 }
  0xd7   : > { %v341_v56 = vor.u32 %v340_v55, %v339_v54  ;;  %v344_v57 = vshll.u32 %v343_v46, 23 }
  0xd9   : > { %v345_v58 = vor.u32 4788187, %v344_v57  ;;  %v348_v60 = vcvt.s32.f32 %v341_v56 }
  0xdb   : > { %v346_v59 = vand.u32 2147483647, %v345_v58 }
  0xdd   : > { %v349_v61 = vmul.f32 %v348_v60, %v346_v59 }
  0xdf   : > { %v350_v62 = vxor.u32 2147483648, %v349_v61 }
  0xe1   : > { %v351_v63 = vsel %vm230_vm13, %v350_v62, %v349_v61 }
  0xe2   : > { %v354_v2 = vsel %vm229_vm14, %v766_v15, %v351_v63 }
  0xe3   : > { %v356_v3 = vmul.f32 %v354_v2, %v354_v2 }
  0xe5   : > { %v357_v4 = vmul.f32 -0.001358992, %v356_v3  ;;  %v364_v5 = vmul.f32 -0.00019511016, %v356_v3 }
  0xe7   : > { %v358_v7 = vadd.f32 0.041655596, %v357_v4  ;;  %v365_v8 = vadd.f32 0.008332121, %v364_v5 }
  0xe9   : > { %v359_v10 = vmul.f32 %v358_v7, %v356_v3  ;;  %v366_v11 = vmul.f32 %v365_v8, %v356_v3 }
  0xeb   : > { %v360_v12 = vadd.f32 -0.4999988, %v359_v10  ;;  %v367_v13 = vadd.f32 -0.16666654, %v366_v11 }
  0xed   : > { %v361_v16 = vmul.f32 %v360_v12, %v356_v3  ;;  %v368_v19 = vmul.f32 %v367_v13, %v356_v3 }
  0xef   : > { %v362_v17 = vadd.f32 1.0, %v361_v16  ;;  %v369_v18 = vadd.f32 1.0, %v368_v19 }
  0xf1   : > { %v370_v21 = vmul.f32 %v369_v18, %v354_v2  ;;  %v379_v22 = vxor.u32 2147483648, %v362_v17 }
  0xf3   : > { %v376_v23 = vxor.u32 2147483648, %v370_v21  ;;  %v380_v27 = vsel %vm378_vm0, %v379_v22, %v370_v21 }
  0xf5   : > { %v377_v25 = vsel %vm375_vm15, %v362_v17, %v376_v23 }
  0xf6   : > { %v381_v29 = vsel %vm374_vm1, %v377_v25, %v380_v27 }
  0xf7   : > { %v382_v30 = vsel %vm371_vm2, nan, %v381_v29 }
  0xf8   : > { %v384_v32 = vadd.f32 %v383_v28, %v382_v30 }
  0xfa   : > { %v389_v33 = vmul.f32 %v387_v31, %v384_v32 }
  0xfc   : > { %391 = vst.msk [vmem:[%s739_s14] sm:$0xff] %vm390_vm3, %v389_v33 }
  0xfd   : > { %580 = shalt.err (!%p577_p3)
}
  0xfe   : > { %489 = dma.vmem_to_hbm [thread:$0]  (%p691_p5), %s406_s13, 128, %s408_s15, %s393_s17  }
  0xff PF: > { %p495_p4 = scmp.ge.s32.totalorder %s617_s22, 2  ;;  %s419_s1 = sand.u32 1, %s605_s19  }
 0x100   : > { %s420_s14 = scalar_lea.sflag [#allocation5], %s419_s1 }
 0x101   : > { %p492_p7 = pnand %p495_p4, %p695_p6 }
 0x103   : > { %p493_p8 = pneg %p492_p7 }
 0x105   : > { %600 = dma.done.wait (%p493_p8), %s420_s14, 128  }
 0x106   : > { %602 = vsyncadd (%p493_p8), %s420_s14, 4294967168  ;;  %s880_s22 = sld [smem:[#allocation9_spill]]  ;;  %s883_s19 = smov %s609_s20 }
 0x107   : > { %s881_s16 = sld [smem:[#allocation8_spill]] }
 0x108   : > { %s882_s21 = sld [smem:[#allocation10_spill]] }
 0x10c   : > { %p22_p9 = scmp.ge.s32.totalorder %s880_s22, 4  }
 0x10d   : > { %s884_s20 = smov %s881_s16 }
 0x10e   :  { %24 = sbr.rel (!%p22_p9) target bundleno = 9 (0x9), region = 75 }
 0x113   :  { %426 = vsyncpa [#allocation5], 1 }
 0x114   :  { %428 = vsyncpa [#allocation5 + $0x1], 1 }

</bundles_post_ra>
